<compile_context>
chip_gen: v7x
topology: tpu7x:2x2x1
jax: 0.10.0
libtpu: 0.0.40
codegen_flags: <defaults>
</compile_context>

<pallas_src>
import functools

import jax
import jax.numpy as jnp
from jax import lax
from jax.experimental import pallas as pl
from jax.experimental.pallas import tpu as pltpu


def _attend_kernel(x_ref, wbd_ref, sel_ref, o_ref, m_sc, l_sc, acc_sc,
                   *, s_valid, s_tile):
    """One (batch, S-chunk) grid step.

    x_ref  : (C, T)  dense spatial chunk of this batch element (input dtype)
    wbd_ref: (H, C)  block-diagonal grouped 1x1x1 conv weight  (input dtype)
    sel_ref: (H, C)  f32 selector, sel[g, c] = 1.0 iff c // cph == g
    o_ref  : (1, C)  per-channel output, written on the last chunk only
    m_sc   : (H, 1)  running per-head max            (VMEM scratch, f32)
    l_sc   : (H, 1)  running per-head softmax denom  (VMEM scratch, f32)
    acc_sc : (H, C)  running exp-weighted sums       (VMEM scratch, f32)
    """
    si = pl.program_id(1)
    last = pl.num_programs(1) - 1

    @pl.when(si == 0)
    def _init():
        m_sc[...] = jnp.full_like(m_sc, -jnp.inf)
        l_sc[...] = jnp.zeros_like(l_sc)
        acc_sc[...] = jnp.zeros_like(acc_sc)

    def update(masked):
        xc = x_ref[...]                                              # (C, T)
        if masked:
            # The out-of-bounds tail of the VMEM block is NOT zero-filled by Pallas;
            # zero x there (keeps the acc matmul NaN-free) and push the corresponding
            # logits to -inf (keeps m and l exact: e == 0 in the tail).
            col = lax.broadcasted_iota(jnp.int32, (1, s_tile), 1)
            in_bounds = (si * s_tile + col) < s_valid                # (1, T)
            xc = jnp.where(in_bounds, xc, 0)

        # Grouped 1x1x1 conv logits for every head of this batch element (MXU).
        # (conv bias dropped: softmax over the spatial axis is shift invariant.)
        logits = jnp.dot(wbd_ref[...], xc,
                         preferred_element_type=jnp.float32)         # (H, T) f32
        if masked:
            logits = jnp.where(in_bounds, logits, -jnp.inf)

        # Online (flash-style) softmax update; statistics always in f32.
        m_prev = m_sc[...]
        m_new = jnp.maximum(m_prev, jnp.max(logits, axis=-1, keepdims=True))  # (H, 1)
        alpha = jnp.exp(m_prev - m_new)                                       # (H, 1)
        e = jnp.exp(logits - m_new)                                           # (H, T)
        l_sc[...] = alpha * l_sc[...] + jnp.sum(e, axis=-1, keepdims=True)

        # exp-weighted sums for this chunk, contracted over T on the MXU ("NT" form).
        part = lax.dot_general(e.astype(xc.dtype), xc,
                               (((1,), (1,)), ((), ())),
                               preferred_element_type=jnp.float32)            # (H, C)
        acc_sc[...] = alpha * acc_sc[...] + part
        m_sc[...] = m_new

    if (s_valid % s_tile) != 0:      # static (trace-time): is there a partial tail chunk?
        @pl.when(si < last)
        def _steady():
            update(masked=False)

        @pl.when(si == last)
        def _tail():
            update(masked=True)
    else:
        update(masked=False)

    @pl.when(si == last)
    def _finalize():
        # Runs once per batch element on tiny tensors: exact reciprocal is free.
        inv_l = pl.reciprocal(l_sc[...], approx=False)               # (H, 1)
        # Block-diagonal select: out[c] = acc[head(c), c] / l[head(c)].
        o_ref[...] = jnp.sum(sel_ref[...] * (acc_sc[...] * inv_l),
                             axis=0, keepdims=True).astype(o_ref.dtype)


def _choose_s_tile(c, num_heads, s, itemsize, vmem_budget=36 * 1024 * 1024):
    """Spatial (lane) tile width.

    Budgets the double-buffered (C, T) x block plus the f32 (H, T) softmax
    intermediates against `vmem_budget`, with dtype-aware sublane padding, and
    prefers a 128-multiple divisor of S so the masked tail chunk disappears
    entirely for common shapes.
    """
    sub = max(8, 32 // itemsize)                 # sublane packing: 8 f32 / 16 bf16 / 32 i8
    padded_c = -(-c // sub) * sub
    padded_h = -(-num_heads // 8) * 8
    # 2 pipeline x buffers + 1 masked-x temp + ~4 f32 (H, T)-sized temporaries.
    per_lane = 3 * padded_c * itemsize + 4 * padded_h * 4
    budget = (vmem_budget // max(1, per_lane)) // 128 * 128
    budget = max(128, budget)
    if s <= budget:
        return int(s)                            # single full-extent block, no masking
    t = budget
    while t >= max(128, budget // 2):
        if s % t == 0:
            return int(t)                        # divisor found: no tail chunk at all
        t -= 128
    return int(budget)                           # tail handled by the masked last chunk


def attend_forward(x, W, bias=None, *, num_heads, s_tile=None):
    """x: (b, C, h, w, z); W: (num_heads, C // num_heads) grouped 1x1x1 conv weight.

    `bias` is accepted for API parity with the PyTorch module but unused: a per-head
    scalar added uniformly over the softmax axis cancels exactly.  Returns
    (b, C, 1, 1, 1) in x.dtype.
    """
    del bias
    b, c, h, w_, z = x.shape
    H = int(num_heads)
    cph = c // H
    S = h * w_ * z

    if s_tile is None:
        s_tile = _choose_s_tile(c, H, S, jnp.dtype(x.dtype).itemsize)
    assert s_tile == S or s_tile % 128 == 0, "s_tile must equal S or be a multiple of 128"
    n_chunks = pl.cdiv(S, s_tile)

    x3 = x.reshape(b, c, S)                      # free reshape: dense (C, s_tile) DMA blocks

    # Block-diagonal grouped-conv weight (H, C) and the matching f32 selector, built
    # once in the wrapper so the kernel consumes them exactly as laid out (no
    # in-kernel reshapes/broadcasts of the weight).
    head_of_c = jnp.arange(c, dtype=jnp.int32) // cph                          # (C,)
    sel = head_of_c[None, :] == jnp.arange(H, dtype=jnp.int32)[:, None]        # (H, C)
    w2 = W.reshape(H, cph).astype(x.dtype)
    w_bd = jnp.where(sel, w2[:, jnp.arange(c) % cph], 0).astype(x.dtype)       # (H, C)
    sel_f = sel.astype(jnp.float32)

    kernel = functools.partial(_attend_kernel, s_valid=S, s_tile=s_tile)

    out = pl.pallas_call(
        kernel,
        out_shape=jax.ShapeDtypeStruct((b, 1, c), x.dtype),
        grid_spec=pltpu.PrefetchScalarGridSpec(
            num_scalar_prefetch=0,
            grid=(b, n_chunks),                  # batch ("parallel"), then S reduction (last)
            in_specs=[
                pl.BlockSpec((None, c, s_tile), lambda bi, si: (bi, 0, si)),
                pl.BlockSpec((H, c), lambda bi, si: (0, 0)),
                pl.BlockSpec((H, c), lambda bi, si: (0, 0)),
            ],
            out_specs=pl.BlockSpec((None, 1, c), lambda bi, si: (bi, 0, 0)),
            scratch_shapes=[
                pltpu.VMEM((H, 1), jnp.float32),     # running per-head max
                pltpu.VMEM((H, 1), jnp.float32),     # running per-head softmax denominator
                pltpu.VMEM((H, c), jnp.float32),     # running exp-weighted sums
            ],
        ),
        compiler_params=pltpu.CompilerParams(
            dimension_semantics=("parallel", "arbitrary"),
            vmem_limit_bytes=56 * 1024 * 1024,   # fits v7x (64 MiB/TC) and v5e/v6e (128 MiB)
        ),
    )(x3, w_bd, sel_f)

    return out.reshape(b, c, 1, 1, 1)


def ref_forward(x, W, bias, num_heads):
    """Pure-JAX reference mirroring the PyTorch forward (bias included, f32 math)."""
    b, c, h, w_, z = x.shape
    cph = c // num_heads
    S = h * w_ * z
    xr = x.astype(jnp.float32).reshape(b * num_heads, cph, S)
    wf = jnp.tile(W.reshape(num_heads, cph), (b, 1)).astype(jnp.float32)
    bf = jnp.tile(bias, b).astype(jnp.float32)
    logits = jnp.einsum("nks,nk->ns", xr, wf) + bf[:, None]
    p = jax.nn.softmax(logits, axis=-1)
    res = jnp.einsum("nks,ns->nk", xr, p)
    return res.reshape(b, c, 1, 1, 1)


if __name__ == "__main__":
    b = 2
    num_heads = 2
    num_features = 8                     # C
    cph = num_features // num_heads      # 4
    h, w, z = 8, 8, 5                    # S = 320 -> multiple chunks + masked tail

    key = jax.random.PRNGKey(0)
    kx, kw = jax.random.split(key)
    x = jax.random.normal(kx, (b, num_features, h, w, z), dtype=jnp.float32)

    # kaiming_normal_(mode='fan_out', relu)-style init for the grouped conv weight
    # (num_heads, cph, 1, 1, 1), stored as (num_heads, cph); bias = 0 as in the module.
    fan_out = num_heads * 1
    std = (2.0 / fan_out) ** 0.5
    W = std * jax.random.normal(kw, (num_heads, cph), dtype=jnp.float32)
    bias = jnp.zeros((num_heads,), dtype=jnp.float32)

    ref = ref_forward(x, W, bias, num_heads)

    # (1) Explicit 128-wide spatial chunks: exercises the online softmax across chunks,
    #     the VMEM accumulators and the masked tail path (320 % 128 != 0).
    out_tiled = jax.block_until_ready(
        attend_forward(x, W, bias, num_heads=num_heads, s_tile=128))
    # (2) Auto-sized tile (single full-extent chunk here, no masking).
    out_auto = jax.block_until_ready(
        attend_forward(x, W, bias, num_heads=num_heads))

    assert out_tiled.shape == (b, num_features, 1, 1, 1)
    assert out_auto.shape == (b, num_features, 1, 1, 1)
    assert jnp.allclose(out_tiled, ref, atol=5e-3, rtol=5e-3), "tiled path mismatch"
    assert jnp.allclose(out_auto, ref, atol=5e-3, rtol=5e-3), "auto-tile path mismatch"

    # (3) bf16 input: MXU bf16 datapath with f32 accumulation (loose tolerance).
    xb = x.astype(jnp.bfloat16)
    out_bf16 = jax.block_until_ready(
        attend_forward(xb, W, bias, num_heads=num_heads, s_tile=128))
    ref_bf16 = ref_forward(xb, W, bias, num_heads)
    assert out_bf16.shape == (b, num_features, 1, 1, 1)
    assert jnp.allclose(out_bf16.astype(jnp.float32), ref_bf16,
                        atol=1e-1, rtol=1e-1), "bf16 path mismatch"

    print("KERNEL_OK")
</pallas_src>

<mosaic_0001>
module attributes {stable_mosaic.version = 11 : i64} {
  func.func @_attend_kernel(%arg0: i32, %arg1: i32, %arg2: memref<1x8x128xf32, #tpu.memory_space<vmem>>, %arg3: memref<2x8xf32, #tpu.memory_space<vmem>>, %arg4: memref<2x8xf32, #tpu.memory_space<vmem>>, %arg5: memref<1x1x8xf32, #tpu.memory_space<vmem>>, %arg6: memref<2x1xf32, #tpu.memory_space<vmem>>, %arg7: memref<2x1xf32, #tpu.memory_space<vmem>>, %arg8: memref<2x8xf32, #tpu.memory_space<vmem>>) attributes {dimension_semantics = [#tpu.dimension_semantics<parallel>, #tpu.dimension_semantics<arbitrary>], iteration_bounds = array<i64: 2, 3>, scalar_prefetch = 0 : i64, scratch_operands = 3 : i64, tpu.core_type = #tpu.core_type<tc>, window_params = [{transform_indices = @transform_0, window_bounds = array<i64: 1, 8, 128>}, {pipeline_mode = #tpu.pipeline_mode<synchronous>, transform_indices = @transform_1, window_bounds = array<i64: 2, 8>}, {pipeline_mode = #tpu.pipeline_mode<synchronous>, transform_indices = @transform_2, window_bounds = array<i64: 2, 8>}, {transform_indices = @transform_3, window_bounds = array<i64: 1, 1, 8>}]} {
    %c0_i32 = arith.constant 0 : i32
    %0 = arith.cmpi eq, %arg1, %c0_i32 : i32
    %1 = arith.extui %0 : i1 to i32
    %c0_i32_0 = arith.constant 0 : i32
    %2 = arith.cmpi ne, %1, %c0_i32_0 : i32
    scf.if %2 {
      %cst = arith.constant 0xFF800000 : f32
      %12 = vector.broadcast %cst : f32 to vector<2x1xf32>
      %c0 = arith.constant 0 : index
      %c0_6 = arith.constant 0 : index
      %13 = vector.load %arg6[%c0, %c0_6] : memref<2x1xf32, #tpu.memory_space<vmem>>, vector<2x1xf32>
      tpu.vector_store %arg6[%c0, %c0_6], %12 {strides = array<i32>} : memref<2x1xf32, #tpu.memory_space<vmem>>, vector<2x1xf32>,
      %cst_7 = arith.constant 0.000000e+00 : f32
      %14 = vector.broadcast %cst_7 : f32 to vector<2x1xf32>
      %c0_8 = arith.constant 0 : index
      %c0_9 = arith.constant 0 : index
      %15 = vector.load %arg7[%c0_8, %c0_9] : memref<2x1xf32, #tpu.memory_space<vmem>>, vector<2x1xf32>
      tpu.vector_store %arg7[%c0_8, %c0_9], %14 {strides = array<i32>} : memref<2x1xf32, #tpu.memory_space<vmem>>, vector<2x1xf32>,
      %cst_10 = arith.constant 0.000000e+00 : f32
      %16 = vector.broadcast %cst_10 : f32 to vector<2x8xf32>
      %c0_11 = arith.constant 0 : index
      %c0_12 = arith.constant 0 : index
      %17 = vector.load %arg8[%c0_11, %c0_12] : memref<2x8xf32, #tpu.memory_space<vmem>>, vector<2x8xf32>
      tpu.vector_store %arg8[%c0_11, %c0_12], %16 {strides = array<i32>} : memref<2x8xf32, #tpu.memory_space<vmem>>, vector<2x8xf32>,
    } else {
    }
    %c2_i32 = arith.constant 2 : i32
    %3 = arith.cmpi slt, %arg1, %c2_i32 : i32
    %4 = arith.extui %3 : i1 to i32
    %c0_i32_1 = arith.constant 0 : i32
    %5 = arith.cmpi ne, %4, %c0_i32_1 : i32
    scf.if %5 {
      %c0 = arith.constant 0 : index
      %c0_6 = arith.constant 0 : index
      %c0_7 = arith.constant 0 : index
      %12 = vector.load %arg2[%c0, %c0_6, %c0_7] : memref<1x8x128xf32, #tpu.memory_space<vmem>>, vector<1x8x128xf32>
      %13 = vector.shape_cast %12 : vector<1x8x128xf32> to vector<8x128xf32>
      %c0_8 = arith.constant 0 : index
      %c0_9 = arith.constant 0 : index
      %14 = vector.load %arg3[%c0_8, %c0_9] : memref<2x8xf32, #tpu.memory_space<vmem>>, vector<2x8xf32>
      %cst = arith.constant dense<0.000000e+00> : vector<2x128xf32>
      %15 = tpu.matmul %14, %13, %cst {dimension_numbers = #tpu.dot_dimension_numbers<[1], [0], [0], [1], [0, 0, 1, 1], [], []>} : vector<2x8xf32>, vector<8x128xf32>, vector<2x128xf32> -> vector<2x128xf32>
      %c0_10 = arith.constant 0 : index
      %c0_11 = arith.constant 0 : index
      %16 = vector.load %arg6[%c0_10, %c0_11] : memref<2x1xf32, #tpu.memory_space<vmem>>, vector<2x1xf32>
      %cst_12 = arith.constant dense<0xFF800000> : vector<2xf32>
      %17 = vector.multi_reduction <maximumf>, %15, %cst_12 [1] : vector<2x128xf32> to vector<2xf32>
      %18 = vector.shape_cast %17 : vector<2xf32> to vector<2x1xf32>
      %19 = arith.maximumf %16, %18 : vector<2x1xf32>
      %20 = arith.subf %16, %19 : vector<2x1xf32>
      %21 = math.exp %20 : vector<2x1xf32>
      %22 = vector.broadcast %19 : vector<2x1xf32> to vector<2x128xf32>
      %23 = arith.subf %15, %22 : vector<2x128xf32>
      %24 = math.exp %23 : vector<2x128xf32>
      %c0_13 = arith.constant 0 : index
      %c0_14 = arith.constant 0 : index
      %25 = vector.load %arg7[%c0_13, %c0_14] : memref<2x1xf32, #tpu.memory_space<vmem>>, vector<2x1xf32>
      %26 = arith.mulf %21, %25 : vector<2x1xf32>
      %cst_15 = arith.constant dense<0.000000e+00> : vector<2xf32>
      %27 = vector.multi_reduction <add>, %24, %cst_15 [1] : vector<2x128xf32> to vector<2xf32>
      %28 = vector.shape_cast %27 : vector<2xf32> to vector<2x1xf32>
      %29 = arith.addf %26, %28 : vector<2x1xf32>
      %c0_16 = arith.constant 0 : index
      %c0_17 = arith.constant 0 : index
      %30 = vector.load %arg7[%c0_16, %c0_17] : memref<2x1xf32, #tpu.memory_space<vmem>>, vector<2x1xf32>
      tpu.vector_store %arg7[%c0_16, %c0_17], %29 {strides = array<i32>} : memref<2x1xf32, #tpu.memory_space<vmem>>, vector<2x1xf32>,
      %cst_18 = arith.constant dense<0.000000e+00> : vector<2x8xf32>
      %31 = tpu.matmul %24, %13, %cst_18 {dimension_numbers = #tpu.dot_dimension_numbers<[1], [1], [0], [0], [0, 0, 1, 0], [], []>} : vector<2x128xf32>, vector<8x128xf32>, vector<2x8xf32> -> vector<2x8xf32>
      %c0_19 = arith.constant 0 : index
      %c0_20 = arith.constant 0 : index
      %32 = vector.load %arg8[%c0_19, %c0_20] : memref<2x8xf32, #tpu.memory_space<vmem>>, vector<2x8xf32>
      %33 = vector.broadcast %21 : vector<2x1xf32> to vector<2x8xf32>
      %34 = arith.mulf %33, %32 : vector<2x8xf32>
      %35 = arith.addf %34, %31 : vector<2x8xf32>
      %c0_21 = arith.constant 0 : index
      %c0_22 = arith.constant 0 : index
      %36 = vector.load %arg8[%c0_21, %c0_22] : memref<2x8xf32, #tpu.memory_space<vmem>>, vector<2x8xf32>
      tpu.vector_store %arg8[%c0_21, %c0_22], %35 {strides = array<i32>} : memref<2x8xf32, #tpu.memory_space<vmem>>, vector<2x8xf32>,
      %c0_23 = arith.constant 0 : index
      %c0_24 = arith.constant 0 : index
      %37 = vector.load %arg6[%c0_23, %c0_24] : memref<2x1xf32, #tpu.memory_space<vmem>>, vector<2x1xf32>
      tpu.vector_store %arg6[%c0_23, %c0_24], %19 {strides = array<i32>} : memref<2x1xf32, #tpu.memory_space<vmem>>, vector<2x1xf32>,
    } else {
    }
    %c2_i32_2 = arith.constant 2 : i32
    %6 = arith.cmpi eq, %arg1, %c2_i32_2 : i32
    %7 = arith.extui %6 : i1 to i32
    %c0_i32_3 = arith.constant 0 : i32
    %8 = arith.cmpi ne, %7, %c0_i32_3 : i32
    scf.if %8 {
      %c0 = arith.constant 0 : index
      %c0_6 = arith.constant 0 : index
      %c0_7 = arith.constant 0 : index
      %12 = vector.load %arg2[%c0, %c0_6, %c0_7] : memref<1x8x128xf32, #tpu.memory_space<vmem>>, vector<1x8x128xf32>
      %13 = vector.shape_cast %12 : vector<1x8x128xf32> to vector<8x128xf32>
      %14 = tpu.iota {dimensions = array<i32: 1>} : vector<1x128xi32>
      %c128_i32 = arith.constant 128 : i32
      %15 = arith.muli %arg1, %c128_i32 : i32
      %16 = vector.broadcast %15 : i32 to vector<1x128xi32>
      %17 = arith.addi %16, %14 : vector<1x128xi32>
      %c320_i32 = arith.constant 320 : i32
      %18 = vector.broadcast %c320_i32 : i32 to vector<1x128xi32>
      %19 = arith.cmpi slt, %17, %18 : vector<1x128xi32>
      %c0_i32_8 = arith.constant 0 : i32
      %20 = arith.sitofp %c0_i32_8 : i32 to f32
      %21 = vector.shape_cast %19 : vector<1x128xi1> to vector<1x128xi1>
      %22 = vector.broadcast %21 : vector<1x128xi1> to vector<8x128xi1>
      %23 = vector.broadcast %20 : f32 to vector<8x128xf32>
      %24 = arith.select %22, %13, %23 : vector<8x128xi1>, vector<8x128xf32>
      %c0_9 = arith.constant 0 : index
      %c0_10 = arith.constant 0 : index
      %25 = vector.load %arg3[%c0_9, %c0_10] : memref<2x8xf32, #tpu.memory_space<vmem>>, vector<2x8xf32>
      %cst = arith.constant dense<0.000000e+00> : vector<2x128xf32>
      %26 = tpu.matmul %25, %24, %cst {dimension_numbers = #tpu.dot_dimension_numbers<[1], [0], [0], [1], [0, 0, 1, 1], [], []>} : vector<2x8xf32>, vector<8x128xf32>, vector<2x128xf32> -> vector<2x128xf32>
      %cst_11 = arith.constant 0xFF800000 : f32
      %27 = vector.shape_cast %19 : vector<1x128xi1> to vector<1x128xi1>
      %28 = vector.broadcast %27 : vector<1x128xi1> to vector<2x128xi1>
      %29 = vector.broadcast %cst_11 : f32 to vector<2x128xf32>
      %30 = arith.select %28, %26, %29 : vector<2x128xi1>, vector<2x128xf32>
      %c0_12 = arith.constant 0 : index
      %c0_13 = arith.constant 0 : index
      %31 = vector.load %arg6[%c0_12, %c0_13] : memref<2x1xf32, #tpu.memory_space<vmem>>, vector<2x1xf32>
      %cst_14 = arith.constant dense<0xFF800000> : vector<2xf32>
      %32 = vector.multi_reduction <maximumf>, %30, %cst_14 [1] : vector<2x128xf32> to vector<2xf32>
      %33 = vector.shape_cast %32 : vector<2xf32> to vector<2x1xf32>
      %34 = arith.maximumf %31, %33 : vector<2x1xf32>
      %35 = arith.subf %31, %34 : vector<2x1xf32>
      %36 = math.exp %35 : vector<2x1xf32>
      %37 = vector.broadcast %34 : vector<2x1xf32> to vector<2x128xf32>
      %38 = arith.subf %30, %37 : vector<2x128xf32>
      %39 = math.exp %38 : vector<2x128xf32>
      %c0_15 = arith.constant 0 : index
      %c0_16 = arith.constant 0 : index
      %40 = vector.load %arg7[%c0_15, %c0_16] : memref<2x1xf32, #tpu.memory_space<vmem>>, vector<2x1xf32>
      %41 = arith.mulf %36, %40 : vector<2x1xf32>
      %cst_17 = arith.constant dense<0.000000e+00> : vector<2xf32>
      %42 = vector.multi_reduction <add>, %39, %cst_17 [1] : vector<2x128xf32> to vector<2xf32>
      %43 = vector.shape_cast %42 : vector<2xf32> to vector<2x1xf32>
      %44 = arith.addf %41, %43 : vector<2x1xf32>
      %c0_18 = arith.constant 0 : index
      %c0_19 = arith.constant 0 : index
      %45 = vector.load %arg7[%c0_18, %c0_19] : memref<2x1xf32, #tpu.memory_space<vmem>>, vector<2x1xf32>
      tpu.vector_store %arg7[%c0_18, %c0_19], %44 {strides = array<i32>} : memref<2x1xf32, #tpu.memory_space<vmem>>, vector<2x1xf32>,
      %cst_20 = arith.constant dense<0.000000e+00> : vector<2x8xf32>
      %46 = tpu.matmul %39, %24, %cst_20 {dimension_numbers = #tpu.dot_dimension_numbers<[1], [1], [0], [0], [0, 0, 1, 0], [], []>} : vector<2x128xf32>, vector<8x128xf32>, vector<2x8xf32> -> vector<2x8xf32>
      %c0_21 = arith.constant 0 : index
      %c0_22 = arith.constant 0 : index
      %47 = vector.load %arg8[%c0_21, %c0_22] : memref<2x8xf32, #tpu.memory_space<vmem>>, vector<2x8xf32>
      %48 = vector.broadcast %36 : vector<2x1xf32> to vector<2x8xf32>
      %49 = arith.mulf %48, %47 : vector<2x8xf32>
      %50 = arith.addf %49, %46 : vector<2x8xf32>
      %c0_23 = arith.constant 0 : index
      %c0_24 = arith.constant 0 : index
      %51 = vector.load %arg8[%c0_23, %c0_24] : memref<2x8xf32, #tpu.memory_space<vmem>>, vector<2x8xf32>
      tpu.vector_store %arg8[%c0_23, %c0_24], %50 {strides = array<i32>} : memref<2x8xf32, #tpu.memory_space<vmem>>, vector<2x8xf32>,
      %c0_25 = arith.constant 0 : index
      %c0_26 = arith.constant 0 : index
      %52 = vector.load %arg6[%c0_25, %c0_26] : memref<2x1xf32, #tpu.memory_space<vmem>>, vector<2x1xf32>
      tpu.vector_store %arg6[%c0_25, %c0_26], %34 {strides = array<i32>} : memref<2x1xf32, #tpu.memory_space<vmem>>, vector<2x1xf32>,
    } else {
    }
    %c2_i32_4 = arith.constant 2 : i32
    %9 = arith.cmpi eq, %arg1, %c2_i32_4 : i32
    %10 = arith.extui %9 : i1 to i32
    %c0_i32_5 = arith.constant 0 : i32
    %11 = arith.cmpi ne, %10, %c0_i32_5 : i32
    scf.if %11 {
      %c0 = arith.constant 0 : index
      %c0_6 = arith.constant 0 : index
      %12 = vector.load %arg7[%c0, %c0_6] : memref<2x1xf32, #tpu.memory_space<vmem>>, vector<2x1xf32>
      %13 = tpu.reciprocal %12 : vector<2x1xf32> -> vector<2x1xf32>
      %c0_7 = arith.constant 0 : index
      %c0_8 = arith.constant 0 : index
      %14 = vector.load %arg4[%c0_7, %c0_8] : memref<2x8xf32, #tpu.memory_space<vmem>>, vector<2x8xf32>
      %c0_9 = arith.constant 0 : index
      %c0_10 = arith.constant 0 : index
      %15 = vector.load %arg8[%c0_9, %c0_10] : memref<2x8xf32, #tpu.memory_space<vmem>>, vector<2x8xf32>
      %16 = vector.broadcast %13 : vector<2x1xf32> to vector<2x8xf32>
      %17 = arith.mulf %15, %16 : vector<2x8xf32>
      %18 = arith.mulf %14, %17 : vector<2x8xf32>
      %cst = arith.constant dense<0.000000e+00> : vector<8xf32>
      %19 = vector.multi_reduction <add>, %18, %cst [0] : vector<2x8xf32> to vector<8xf32>
      %20 = vector.shape_cast %19 : vector<8xf32> to vector<1x8xf32>
      %c0_11 = arith.constant 0 : index
      %c0_12 = arith.constant 0 : index
      %c0_13 = arith.constant 0 : index
      %21 = vector.load %arg5[%c0_11, %c0_12, %c0_13] : memref<1x1x8xf32, #tpu.memory_space<vmem>>, vector<1x1x8xf32>
      %22 = vector.shape_cast %21 : vector<1x1x8xf32> to vector<1x8xf32>
      %23 = vector.shape_cast %20 : vector<1x8xf32> to vector<1x1x8xf32>
      tpu.vector_store %arg5[%c0_11, %c0_12, %c0_13], %23 {strides = array<i32>} : memref<1x1x8xf32, #tpu.memory_space<vmem>>, vector<1x1x8xf32>,
    } else {
    }
    return
  }
  func.func @transform_0(%arg0: i32, %arg1: i32) -> (i32, i32, i32) {
    %c0_i32 = arith.constant 0 : i32
    %c0_i32_0 = arith.constant 0 : i32
    return %arg0, %c0_i32, %arg1 : i32, i32, i32
  }
  func.func @transform_1(%arg0: i32, %arg1: i32) -> (i32, i32) {
    %c0_i32 = arith.constant 0 : i32
    %c0_i32_0 = arith.constant 0 : i32
    %c0_i32_1 = arith.constant 0 : i32
    return %c0_i32, %c0_i32_0 : i32, i32
  }
  func.func @transform_2(%arg0: i32, %arg1: i32) -> (i32, i32) {
    %c0_i32 = arith.constant 0 : i32
    %c0_i32_0 = arith.constant 0 : i32
    %c0_i32_1 = arith.constant 0 : i32
    return %c0_i32, %c0_i32_0 : i32, i32
  }
  func.func @transform_3(%arg0: i32, %arg1: i32) -> (i32, i32, i32) {
    %c0_i32 = arith.constant 0 : i32
    %c0_i32_0 = arith.constant 0 : i32
    %c0_i32_1 = arith.constant 0 : i32
    return %arg0, %c0_i32, %c0_i32_0 : i32, i32, i32
  }
}

</mosaic_0001>

<bundles_post_ra>
// kernel: tpu_custom_call.1
= control target key start
LH: loop header
LB: loop body
LE: loop exit
PB: predicated region body
PF: predicated region fallthrough
CT: control target
= control target key end

     0   :  { %8 = vsyncpa [#allocation6], 0  ;;  %s1306_s0 = inlined_call_operand.hbm [shape: f32[2,8,320], index: 0, kind: input, shape index: {}]   ;;  %s1307_s1 = inlined_call_operand.vmem [shape: f32[2,8], index: 1, kind: input, shape index: {}]   ;;  %s1308_s2 = inlined_call_operand.vmem [shape: f32[2,8], index: 2, kind: input, shape index: {}]   ;;  %s1309_s3 = inlined_call_operand.hbm [shape: f32[2,1,8], index: 3, kind: output, shape index: {}]  }
   0x1   :  { %10 = vsyncpa [#allocation6 + $0x1], 0 }
   0x2   :  { %11 = vsyncpa [#allocation7], 0 }
   0x3   :  { %13 = vsyncpa [#allocation7 + $0x1], 0  ;;  %s1060_s12 = smov 0   ;;  %s1062_s13 = smov 0  }
   0x4   :  { %s1064_s14 = smov 0   ;;  %s1066_s15 = smov 0  }
   0x5   :  { %s1068_s16 = smov 0   ;;  %s1070_s17 = smov 0  }
   0x6   :  { %s1072_s18 = smov 0   ;;  %s1074_s19 = smov 0  }
   0x7   :  { %s1076_s20 = smov 0   ;;  %s1078_s21 = smov 0  }
   0x8   :  { %s1080_s22 = smov 0  }
   0x9 LB: > { %s704_s23 = sadd.s32 4294967295, %s1028_s22   ;;  %s705_s24 = sadd.s32 4294967294, %s1028_s22   ;;  %s1028_s22 = sphi %s1080_s22, %s19_s22   ;;  %s1024_s21 = sphi %s1078_s21, %s1334_s21   ;;  %s1020_s20 = sphi %s1076_s20, %s1333_s20   ;;  %s1016_s19 = sphi %s1074_s19, %s1332_s19   ;;  %s1012_s18 = sphi %s1072_s18, %s1331_s18   ;;  %s1008_s17 = sphi %s1070_s17, %s1330_s17   ;;  %s1004_s16 = sphi %s1068_s16, %s1329_s16   ;;  %s1000_s15 = sphi %s1066_s15, %s1328_s15   ;;  %s996_s14 = sphi %s1064_s14, %s1327_s14   ;;  %s992_s13 = sphi %s1062_s13, %s1326_s13   ;;  %s988_s12 = sphi %s1060_s12, %s1325_s12  }
   0xa   : > { %s28_s25 = sadd.s32 1, %s1020_s20  ;;  %s31_s26 = sadd.s32 1, %s1024_s21 }
   0xb   : > { %p29_p0 = scmp.ge.s32.totalorder %s28_s25, 3  ;;  %s40_s27 = sadd.s32 1, %s1008_s17 }
   0xc   : > { %p47_p1 = scmp.ne.s32.totalorder %s1008_s17, %s1004_s16  ;;  %p48_p2 = scmp.eq.s32.totalorder %s1028_s22, 0 }
   0xd   : > { %s1336_s25 = smov (%p29_p0, %s28_s25), 0  ;;  %s1338_s26 = smov (!%p29_p0, %s31_s26), %s1024_s21 }
   0xe   : > { %1313 = sst [smem:[#allocation11_spill]] %s1336_s25  ;;  %s36_s28 = ssub.s32 %s1020_s20, %s1336_s25 }
   0xf   : > { %p1126_p3 = por %p48_p2, %p47_p1  ;;  %p33_p4 = scmp.ge.s32.totalorder %s1338_s26, 2 }
  0x10   : > { %p53_p5 = scmp.ne.s32.totalorder %s1004_s16, %s1000_s15  ;;  %p54_p6 = scmp.eq.s32.totalorder %s704_s23, 0 }
  0x11   : > { %s108_s30 = sadd.s32 1, %s996_s14  ;;  %s1340_s26 = smov (%p33_p4, %s1338_s26), 0 }
  0x12   : > { %1315 = sst [smem:[#allocation12_spill]] %s1340_s26  ;;  %p1134_p7 = por %p54_p6, %p53_p5 }
  0x13   : > { %p118_p8 = scmp.ne.s32.totalorder %s996_s14, %s992_s13  ;;  %s35_s5 = ssub.s32 %s1024_s21, %s1340_s26 }
  0x14   : > { %p119_p9 = scmp.eq.s32.totalorder %s704_s23, 5  ;;  %s37_s6 = sor.u32 %s36_s28, %s35_s5 }
  0x15   : > { %p106_p10 = scmp.eq.s32.totalorder %s35_s5, 0  ;;  %p38_p11 = scmp.eq.s32.totalorder %s37_s6, 0 }
  0x16   : > { %p1142_p12 = por %p119_p9, %p118_p8  ;;  %p124_p13 = scmp.ne.s32.totalorder %s992_s13, %s988_s12 }
  0x17   : > { %s1147_s8 = scalar_select %p106_p10, %s996_s14, %s108_s30  }
  0x18   : > { %s1317_s7 = scalar_select %p1142_p12, 1, 0 }
  0x19   : > { %s1150_s9 = scalar_select %p38_p11, %s1008_s17, %s40_s27  }
  0x1a   : > { %p125_p0 = scmp.eq.s32.totalorder %s705_s24, 5  ;;  %p764_p1 = scmp.lt.s32.totalorder %s1028_s22, 6 }
  0x1b   : > { %s151_s11 = sand.u32 1, %s1008_s17   ;;  %s751_s23 = smul.u32 3, %s1024_s21 }
  0x1c   : > { %p1155_p2 = por %p125_p0, %p124_p13  ;;  %s708_s15 = sshll.u32 %s151_s11, 3 }
  0x1d   : > { %s155_s28 = scalar_lea.vmem [#allocation5], %s708_s15  ;;  %p1163_p4 = pnand %p764_p1, %p1126_p3 }
  0x1e   : > { %s1318_s10 = scalar_select %p1155_p2, 1, 0 }
  0x1f   : > { %s164_s5 = sshll.u32 %s155_s28, 4  ;;  %s160_s27 = sadd.s32 %s1020_s20, %s751_s23  ;;  %s1168_s5 = int_to_ptr.vmem [resolvable:$true] %s164_s5 }
  0x20   : > { %s709_s24 = sshll.u32 %s160_s27, 7  ;;  %s152_s29 = scalar_lea.sflag [#allocation6], %s151_s11 }
  0x21   : > { %s1173_s25 = scalar_lea.hbm %s1306_s0, %s709_s24  ;;  %p878_p6 = pneg %p1163_p4 }
  0x22   : > { %s876_s15 = scalar_lea.hbm %s1173_s25, 128  ;;  %s881_s26 = scalar_lea.hbm %s1306_s0, 768 }
  0x23   : > { %p877_p3 = scmp.ne.s32.totalorder %s1173_s25, %s876_s15  ;;  %p882_p10 = scmp.lt.u32.totalorder %s1173_s25, %s1306_s0 }
  0x24   : > { %p883_p11 = scmp.lt.u32.totalorder %s881_s26, %s876_s15  ;;  %p885_p0 = scmp.lt.u32.totalorder %s876_s15, %s1173_s25 }
  0x25   : > { %p879_p8 = pnand %p878_p6, %p877_p3 }
  0x26   : > { %p884_p13 = por %p883_p11, %p882_p10 }
  0x27   : > { %p880_p9 = pneg %p879_p8 }
  0x28   : > { %p886_p1 = por %p885_p0, %p884_p13 }
  0x2a   : > { %p887_p5 = pnand %p886_p1, %p880_p9 }
  0x2c   : > { %890 = shalt.err (!%p887_p5)
}
  0x2d   : > { %s891_s11 = scalar_lea.vmem %s1168_s5, 128  ;;  %s1030_s30 = smov [#allocation5]  }
  0x2e   : > { %p892_p3 = scmp.ne.s32.totalorder %s1168_s5, %s891_s11  ;;  %s896_s23 = sshll.u32 %s1030_s30, 4  ;;  %s897_s23 = int_to_ptr.vmem [resolvable:$false] %s896_s23 }
  0x2f   : > { %s898_s28 = scalar_lea.vmem %s897_s23, 256  ;;  %p899_p12 = scmp.lt.s32.totalorder %s1168_s5, %s897_s23 }
  0x30   : > { %p894_p8 = pnand %p892_p3, %p878_p6  ;;  %p900_p10 = scmp.lt.s32.totalorder %s898_s28, %s891_s11 }
  0x32   : > { %p895_p2 = pneg %p894_p8  ;;  %p901_p11 = por %p900_p10, %p899_p12 }
  0x34   : > { %p902_p13 = pnand %p901_p11, %p895_p2 }
  0x36   : > { %905 = shalt.err (!%p902_p13)
}
  0x37   : > { %759 = dma.hbm_to_vmem [thread:$0]  (!%p1163_p4), %s1173_s25, 128, %s1168_s5, %s152_s29  }
  0x38   : > { %p169_p5 = scmp.lt.s32.totalorder %s1028_s22, 7  ;;  %p1320_p9 = scmp.ge.s32.totalorder %s1028_s22, 1 }
  0x3a   : > { %p170_p6 = pnand %p1320_p9, %p169_p5 }
  0x3b   : > { %s175_s15 = sand.u32 (!%p170_p6), 1, %s1004_s16  }
  0x3c   : > { %173 = sbr.rel (%p170_p6) target bundleno = 1641 (0x669), region = 32  ;;  %s1205_s26 = sshll.u32 (!%p170_p6), %s175_s15, 3 }
  0x3d   : > { %s176_s27 = scalar_lea.sflag (!%p170_p6), [#allocation6], %s175_s15  ;;  %s179_s24 = scalar_lea.vmem (!%p170_p6), [#allocation5], %s1205_s26 }
  0x43   : > { %979 = dma.done.wait (%p1134_p7), %s176_s27, 128  }
  0x44   : > { %981 = vsyncadd (%p1134_p7), %s176_s27, 4294967168  ;;  %s199_s25 = sand.u32 1, %s992_s13   ;;  %p712_p12 = scmp.ne.s32.totalorder %s1012_s18, 0 }
  0x45   : > { %s1215_s5 = scalar_lea.vmem [#allocation8], %s199_s25  ;;  %vm205_vm0 = vcmask (!%p712_p12), 1024   ;;  %vm208_vm1 = vcmask (!%p712_p12), 58368   ;;  %v1031_v0 = vmov (!%p712_p12), -inf   ;;  %v1032_v1 = vmov (!%p712_p12), 0.0  }
  0x46   : > { %204 = sbr.rel (%p712_p12) target bundleno = 77 (0x4d), region = 40  ;;  %206 = vst.msk [vmem:[#allocation2] sm:$0x3] (!%p712_p12), %vm205_vm0, %v1031_v0  ;;  %207 = vst.msk [vmem:[#allocation3] sm:$0x3] (!%p712_p12), %vm205_vm0, %v1032_v1 }
  0x47   : > { %209 = vst.msk [vmem:[#allocation4] sm:$0x3] (!%p712_p12), %vm208_vm1, %v1032_v1 }
  0x4d PF: > { %p713_p2 = scmp.ge.s32.totalorder %s1012_s18, 2 }
  0x4e   : > { %v214_v2 = vld [vmem:[%s179_s24] sm:$0xff] (!%p713_p2)  ;;  %v215_v3 = vld [vmem:[%s1307_s1] sm:$0x3] (!%p713_p2)  ;;  %vm216_vm2 = vcmask (!%p713_p2), 64512   ;;  %v1033_v4 = vmov (!%p713_p2), 0.0   ;;  %vm1034_vm3 = vmmov (!%p713_p2), 0  }
  0x4f   : > { %213 = sbr.rel (%p713_p2) target bundleno = 796 (0x31c), region = 44  ;;  %731 = vmatprep.subr.mxu0 (!%p713_p2), %v1033_v4  ;;  %733 = vmatprep.mubr.msk.f32.mxu0 (!%p713_p2), %vm1034_vm3, %v1033_v4  ;;  %vm291_vm4 = vcmask (!%p713_p2), 1041408   ;;  %v1035_v8 = vmov (!%p713_p2), 0   ;;  %v290_v9 = vld [vmem:[#allocation2] sm:$0x3] (!%p713_p2)  ;;  %vm313_vm5 = vcmask (!%p713_p2), 1024  }
  0x50   : > { %732 = vmatpush3.msra.mxu0 (!%p713_p2), %v214_v2  ;;  %736 = vmatprep.subr.mxu1 (!%p713_p2), %v1033_v4  ;;  %v307_v20 = vld [vmem:[#allocation3] sm:$0x3] (!%p713_p2)  ;;  %v385_v24 = vld [vmem:[#allocation4] sm:$0x3] (!%p713_p2)  ;;  %vm393_vm6 = vcmask (!%p713_p2), 58368  }
  0x51   : > { %734 = vmatmul.mubr.msk.f32.vlgmr.msra.gmra.mrb[0].mxu0 (!%p713_p2), %vm216_vm2, %v215_v3  ;;  %737 = vmatpush3.xpose.msra.mxu1 (!%p713_p2), %v214_v2 }
  0x52   : > { %738 = vmatprep.mubr.msk.f32.mxu1 (!%p713_p2), %vm1034_vm3, %v1033_v4  ;;  %862 = vset.pattern.permute.xlu0 (!%p713_p2), %v1035_v8 }
  0x53   : > { %863 = vset.pattern.permute.xlu1 (!%p713_p2), %v1035_v8 }
 0x124   : > { %v286_v5 = vpop.f32.mrb[0].mxu0 }
 0x125   : > { %v735_v6 = vpop.f32.mrb[1].mxu0  ;;  %v292_v7 = vsel %vm291_vm4, %v286_v5, -inf }
 0x126   : > { %293 = vmax.xlane.f32.xlu0 %v292_v7 }
 0x1b3   : > { %v294_v10 = vpop.xlane.xlu0 %293 }
 0x1b4   : > { %v295_v11 = vmax.f32 %v290_v9, %v294_v10 }
 0x1b6   : > { %v296_v12 = vsub.f32 %v290_v9, %v295_v11  ;;  %395 = vst.msk [vmem:[#allocation2] sm:$0x3] %vm313_vm5, %v295_v11  ;;  %301 = vperm.xlu0 %862, %v295_v11  }
 0x1b8   : > { %v297_v18 = vmul.f32 1.442695, %v296_v12 }
 0x235   : > { %v302_v13 = vpop.permute.xlu0 %301 }
 0x236   : > { %v304_v14 = vsub.f32 %v286_v5, %v302_v13 }
 0x238   : > { %v305_v15 = vmul.f32 1.442695, %v304_v14 }
 0x23a   : > { %864 = vpow2.f32 %v305_v15 }
 0x23b   : > { %866 = vpow2.f32 %v297_v18 }
 0x244   : > { %v865_v16 = vpop.eup %864 }
 0x245   : > { %739 = vmatmul.mubr.f32.vlgmr.msra.gmra.mrb[0].mxu1 %v865_v16  ;;  %v309_v17 = vsel %vm291_vm4, %v865_v16, 0.0  ;;  %v867_v19 = vpop.eup %866 }
 0x246   : > { %310 = vadd.xlane.f32.xlu1 %v309_v17  ;;  %v308_v21 = vmul.f32 %v867_v19, %v307_v20 }
 0x257   : > { %388 = vperm.xlu1 %863, %v867_v19  }
 0x2d3   : > { %v311_v22 = vpop.xlane.xlu1 %310 }
 0x2d4   : > { %v312_v23 = vadd.f32 %v311_v22, %v308_v21 }
 0x2d6   : > { %314 = vst.msk [vmem:[#allocation3] sm:$0x3] %vm313_vm5, %v312_v23 }
 0x2d7   : > { %v389_v25 = vpop.permute.xlu1 %388 }
 0x2d8   : > { %v391_v26 = vmul.f32 %v389_v25, %v385_v24 }
 0x318   : > { %v381_v27 = vpop.f32.mrb[0].mxu1 }
 0x319   : > { %v392_v28 = vadd.f32 %v391_v26, %v381_v27  ;;  %v740_v29 = vpop.f32.mrb[1].mxu1 }
 0x31b   : > { %394 = vst.msk [vmem:[#allocation4] sm:$0x3] %vm393_vm6, %v392_v28 }
 0x31c PF: > { %p715_p7 = scmp.ne.s32.totalorder %s1012_s18, 2 }
 0x31d   : > { %v401_v30 = vlaneseq (!%p715_p7)  ;;  %s716_s29 = sshll.u32 (!%p715_p7), %s1012_s18, 7  ;;  %v1036_v31 = vmov (!%p715_p7), 0.0   ;;  %vm1037_vm7 = vmmov (!%p715_p7), 0   ;;  %v400_v34 = vld [vmem:[%s179_s24] sm:$0xff] (!%p715_p7)  ;;  %v410_v36 = vld [vmem:[%s1307_s1] sm:$0x3] (!%p715_p7) }
 0x31e   : > { %399 = sbr.rel (%p715_p7) target bundleno = 1616 (0x650), region = 48  ;;  %741 = vmatprep.subr.mxu0 (!%p715_p7), %v1036_v31  ;;  %v404_v32 = vstv (!%p715_p7), %s716_s29  ;;  %743 = vmatprep.mubr.msk.f32.mxu0 (!%p715_p7), %vm1037_vm7, %v1036_v31  ;;  %vm411_vm8 = vcmask (!%p715_p7), 64512   ;;  %vm487_vm10 = vcmask (!%p715_p7), 1041408   ;;  %v1038_v41 = vmov (!%p715_p7), 0   ;;  %v486_v42 = vld [vmem:[#allocation2] sm:$0x3] (!%p715_p7) }
 0x31f   : > { %v402_v33 = vand.u32 (!%p715_p7), 127, %v401_v30  ;;  %746 = vmatprep.subr.mxu1 (!%p715_p7), %v1036_v31  ;;  %748 = vmatprep.mubr.msk.f32.mxu1 (!%p715_p7), %vm1037_vm7, %v1036_v31  ;;  %vm509_vm11 = vcmask (!%p715_p7), 1024   ;;  %v503_v53 = vld [vmem:[#allocation3] sm:$0x3] (!%p715_p7)  ;;  %vm589_vm12 = vcmask (!%p715_p7), 58368   ;;  %vm610_vm13 = vcmask (!%p715_p7), 57344  }
 0x320   : > { %868 = vset.pattern.permute.xlu0 (!%p715_p7), %v1038_v41  ;;  %869 = vset.pattern.permute.xlu1 (!%p715_p7), %v1038_v41  ;;  %v594_v1 = vld [vmem:[%s1308_s2] sm:$0x3] (!%p715_p7) }
 0x321   : > { %v405_v35 = vadd.s32 (!%p715_p7), %v404_v32, %v402_v33 }
 0x322   : > { %v581_v59 = vld [vmem:[#allocation4] sm:$0x3] (!%p715_p7) }
 0x323   : > { %vm406_vm9 = vcmp.lt.s32.totalorder (!%p715_p7), %v405_v35, 320 }
 0x324   : > { %742 = vmatpush3.msk.msra.mxu0 (!%p715_p7), %vm406_vm9, %v400_v34  ;;  %747 = vmatpush3.xpose.msk.msra.mxu1 (!%p715_p7), %vm406_vm9, %v400_v34 }
 0x325   : > { %744 = vmatmul.mubr.msk.f32.vlgmr.msra.gmra.mrb[0].mxu0 %vm411_vm8, %v410_v36 }
 0x3f8   : > { %v481_v37 = vpop.f32.mrb[0].mxu0 }
 0x3f9   : > { %v485_v38 = vsel %vm406_vm9, %v481_v37, -inf  ;;  %v745_v39 = vpop.f32.mrb[1].mxu0 }
 0x3fa   : > { %v488_v40 = vsel %vm487_vm10, %v485_v38, -inf }
 0x3fb   : > { %489 = vmax.xlane.f32.xlu0 %v488_v40 }
 0x488   : > { %v490_v43 = vpop.xlane.xlu0 %489 }
 0x489   : > { %v491_v44 = vmax.f32 %v486_v42, %v490_v43 }
 0x48b   : > { %v492_v45 = vsub.f32 %v486_v42, %v491_v44  ;;  %591 = vst.msk [vmem:[#allocation2] sm:$0x3] %vm509_vm11, %v491_v44  ;;  %497 = vperm.xlu0 %868, %v491_v44  }
 0x48d   : > { %v493_v51 = vmul.f32 1.442695, %v492_v45 }
 0x50a   : > { %v498_v46 = vpop.permute.xlu0 %497 }
 0x50b   : > { %v500_v47 = vsub.f32 %v485_v38, %v498_v46 }
 0x50d   : > { %v501_v48 = vmul.f32 1.442695, %v500_v47 }
 0x50f   : > { %870 = vpow2.f32 %v501_v48 }
 0x510   : > { %872 = vpow2.f32 %v493_v51 }
 0x519   : > { %v871_v49 = vpop.eup %870 }
 0x51a   : > { %749 = vmatmul.mubr.f32.vlgmr.msra.gmra.mrb[0].mxu1 %v871_v49  ;;  %v505_v50 = vsel %vm487_vm10, %v871_v49, 0.0  ;;  %v873_v52 = vpop.eup %872 }
 0x51b   : > { %506 = vadd.xlane.f32.xlu1 %v505_v50  ;;  %v504_v54 = vmul.f32 %v873_v52, %v503_v53 }
 0x52c   : > { %584 = vperm.xlu1 %869, %v873_v52  }
 0x5a8   : > { %v507_v55 = vpop.xlane.xlu1 %506 }
 0x5a9   : > { %v508_v56 = vadd.f32 %v507_v55, %v504_v54 }
 0x5ab   : > { %510 = vst.msk [vmem:[#allocation3] sm:$0x3] %vm509_vm11, %v508_v56 }
 0x5ac   : > { %v585_v60 = vpop.permute.xlu1 %584 }
 0x5ad   : > { %v587_v61 = vmul.f32 %v585_v60, %v581_v59 }
 0x5b2   : > { %v592_v57 = vld [vmem:[#allocation3] sm:$0x3] }
 0x5b3   : > { %874 = vrcp.f32 %v592_v57 }
 0x5bd   : > { %v875_v58 = vpop.eup %874 }
 0x5be   : > { %598 = vperm.xlu1 %869, %v875_v58  }
 0x5ed   : > { %v577_v62 = vpop.f32.mrb[0].mxu1 }
 0x5ee   : > { %v588_v63 = vadd.f32 %v587_v61, %v577_v62  ;;  %v750_v0 = vpop.f32.mrb[1].mxu1 }
 0x5f0   : > { %590 = vst.msk [vmem:[#allocation4] sm:$0x3] %vm589_vm12, %v588_v63 }
 0x5f7   : > { %v595_v2 = vld [vmem:[#allocation4] sm:$0x3] }
 0x63d   : > { %v599_v3 = vpop.permute.xlu1 %598 }
 0x63e   : > { %v601_v4 = vmul.f32 %v599_v3, %v595_v2 }
 0x640   : > { %v602_v5 = vmul.f32 %v601_v4, %v594_v1 }
 0x642   : > { %v603_v6 = vsel %vm589_vm12, %v602_v5, 0.0 }
 0x643   : > { %v604_v7 = vrot.slane %v603_v6, 4 }
 0x645   : > { %v605_v8 = vadd.f32 %v604_v7, %v603_v6 }
 0x647   : > { %v606_v9 = vrot.slane %v605_v8, 2 }
 0x649   : > { %v607_v10 = vadd.f32 %v606_v9, %v605_v8 }
 0x64b   : > { %v608_v11 = vrot.slane %v607_v10, 1 }
 0x64d   : > { %v609_v12 = vadd.f32 %v608_v11, %v607_v10 }
 0x64f   : > { %611 = vst.msk [vmem:[%s1215_s5] sm:$0x1] %vm610_vm13, %v609_v12 }
 0x650 PF: > { %s720_s28 = sshll.u32 %s1016_s19, 4  ;;  %s625_s24 = sshll.u32 %s1215_s5, 4  ;;  %s626_s24 = int_to_ptr.vmem [resolvable:$true] %s625_s24 }
 0x651   : > { %s1247_s27 = scalar_lea.hbm %s1309_s3, %s720_s28  ;;  %s613_s4 = scalar_lea.sflag [#allocation7], %s199_s25 }
 0x652   : > { %s906_s6 = scalar_lea.vmem %s626_s24, 16  ;;  %p1321_p0 = scmp.ne.s32.totalorder %s1317_s7, 0 }
 0x653   : > { %p907_p4 = scmp.ne.s32.totalorder %s626_s24, %s906_s6  ;;  %s1039_s29 = smov [#allocation8]  }
 0x654   : > { %s910_s11 = sshll.u32 %s1039_s29, 4  ;;  %s911_s11 = int_to_ptr.vmem [resolvable:$false] %s910_s11 }
 0x655   : > { %p908_p1 = pnand %p907_p4, %p1321_p0  ;;  %s912_s30 = scalar_lea.vmem %s911_s11, 32 }
 0x656   : > { %p913_p8 = scmp.lt.s32.totalorder %s626_s24, %s911_s11  ;;  %p914_p10 = scmp.lt.s32.totalorder %s912_s30, %s906_s6 }
 0x657   : > { %p909_p3 = pneg %p908_p1 }
 0x658   : > { %p915_p11 = por %p914_p10, %p913_p8 }
 0x65a   : > { %p916_p13 = pnand %p915_p11, %p909_p3 }
 0x65c   : > { %919 = shalt.err (!%p916_p13)
}
 0x65d   : > { %s920_s19 = scalar_lea.hbm %s1247_s27, 16  ;;  %s924_s18 = scalar_lea.hbm %s1309_s3, 32 }
 0x65e   : > { %p921_p5 = scmp.ne.s32.totalorder %s1247_s27, %s920_s19  ;;  %p925_p12 = scmp.lt.u32.totalorder %s1247_s27, %s1309_s3 }
 0x65f   : > { %p926_p2 = scmp.lt.u32.totalorder %s924_s18, %s920_s19  ;;  %p928_p4 = scmp.lt.u32.totalorder %s920_s19, %s1247_s27 }
 0x660   : > { %p922_p9 = pnand %p921_p5, %p1321_p0 }
 0x661   : > { %p927_p7 = por %p926_p2, %p925_p12 }
 0x662   : > { %p923_p6 = pneg %p922_p9 }
 0x663   : > { %p929_p1 = por %p928_p4, %p927_p7 }
 0x665   : > { %p930_p3 = pnand %p929_p1, %p923_p6 }
 0x667   : > { %933 = shalt.err (!%p930_p3)
}
 0x668   : > { %754 = dma.vmem_to_hbm [thread:$0]  (%p1321_p0), %s626_s24, 16, %s1247_s27, %s613_s4  }
 0x669 PF: > { %p765_p8 = scmp.ge.s32.totalorder %s1028_s22, 2  ;;  %s637_s15 = sand.u32 1, %s988_s12  }
 0x66a   : > { %p1322_p10 = scmp.ne.s32.totalorder %s1318_s10, 0  ;;  %s638_s26 = scalar_lea.sflag [#allocation7], %s637_s15 }
 0x66c   : > { %p761_p11 = pnand %p765_p8, %p1322_p10 }
 0x66e   : > { %983 = dma.done.wait (!%p761_p11), %s638_s26, 16  }
 0x66f   : > { %985 = vsyncadd (!%p761_p11), %s638_s26, 4294967280  ;;  %s19_s22 = sadd.s32 1, %s1028_s22   ;;  %s1323_s7 = sld [smem:[#allocation11_spill]] }
 0x670   : > { %p16_p13 = scmp.ge.s32.totalorder %s19_s22, 8   ;;  %s1324_s27 = sld [smem:[#allocation12_spill]] }
 0x671   : > { %s1325_s12 = smov %s992_s13  ;;  %s1326_s13 = smov %s996_s14 }
 0x672   : > { %s1327_s14 = smov %s1147_s8  ;;  %s1328_s15 = smov %s1004_s16 }
 0x673   : > { %s1329_s16 = smov %s1008_s17  ;;  %s1330_s17 = smov %s1150_s9 }
 0x674   : > { %s1331_s18 = smov %s1020_s20  ;;  %s1332_s19 = smov %s1024_s21 }
 0x675   : > { %s1333_s20 = smov %s1323_s7  ;;  %18 = sbr.rel (!%p16_p13) target bundleno = 9 (0x9), region = 89 }
 0x676   : > { %s1334_s21 = smov %s1324_s27 }
 0x67c   :  { %642 = vsyncpa [#allocation6], 1 }
 0x67d   :  { %644 = vsyncpa [#allocation6 + $0x1], 1 }
 0x67e   :  { %645 = vsyncpa [#allocation7], 1 }
 0x67f   :  { %647 = vsyncpa [#allocation7 + $0x1], 1 }

</bundles_post_ra>
